<compile_context>
chip_gen: v7x
topology: tpu7x:2x2x1
jax: 0.10.0
libtpu: 0.0.40
codegen_flags: <defaults>
</compile_context>

<pallas_src>
import jax
import jax.numpy as jnp
from jax.experimental import pallas as pl
from jax.experimental.pallas import tpu as pltpu


def _round_up(x, m):
    return (x + m - 1) // m * m


def _mlp_kernel(x_ref, w1_ref, b1_ref, w2_ref, b2_ref, w3_ref, b3_ref, o_ref):
    cdt = w1_ref.dtype  # MXU compute dtype (bf16 on the perf path, f32 for checks)
    # x arrives in its original dtype; cast in-kernel (rides a free VPU slot).
    x = x_ref[...].astype(cdt)
    # layer 1: linear (f32 accumulate) + bias (f32) + tanh (compute dtype)
    h = jnp.dot(x, w1_ref[...], preferred_element_type=jnp.float32)
    h = jnp.tanh((h + b1_ref[...]).astype(cdt))
    # layer 2
    h = jnp.dot(h, w2_ref[...], preferred_element_type=jnp.float32)
    h = jnp.tanh((h + b2_ref[...]).astype(cdt))
    # logits head: no activation, stored at the TRUE action width (no lane pad)
    out = jnp.dot(h, w3_ref[...], preferred_element_type=jnp.float32) + b3_ref[...]
    o_ref[...] = out.astype(o_ref.dtype)


def prepare_params(params, compute_dtype=jnp.bfloat16):
    """One-time param prep (hoisted out of the per-call path): cast weights to
    the MXU compute dtype, keep biases in f32 as (1, out) rows."""
    w1, b1, w2, b2, w3, b3 = params
    cw = lambda w: jnp.asarray(w, compute_dtype)
    cb = lambda b: jnp.asarray(b, jnp.float32).reshape(1, -1)
    return (cw(w1), cb(b1), cw(w2), cb(b2), cw(w3), cb(b3))


def categorical_pi_net(x, prepped_params, *, block_b=None):
    """Fused MLP policy head.  x: (B, dim_feat) f32 -> logits (B, dim_act) f32."""
    w1, b1, w2, b2, w3, b3 = prepped_params
    B, F = x.shape
    H1, H2, A = w1.shape[1], w2.shape[1], w3.shape[1]
    cdt = w1.dtype

    # Batch tile: large (step overhead-bound otherwise), but keep >= ~4 grid
    # steps so v7x's two TensorCores both get work; cap at 8192 rows so all
    # double-buffered tiles + intermediates stay a few MiB (< 32 MiB scoped
    # VMEM, and comfortably under v7x's 64 MiB physical VMEM).
    if block_b is None:
        block_b = max(8, min(8192, _round_up(max(1, B // 4), 8)))
    block_b = min(_round_up(block_b, 8), _round_up(B, 8))
    grid = (pl.cdiv(B, block_b),)
    # NOTE: if B % block_b != 0, the final partial tile reads rows past B
    # (uninitialized VMEM) through tanh/matmul; those rows are never written
    # back, so this is benign even if they contain NaN/Inf.

    const2d = lambda i: (0, 0)  # weights/biases: constant block, DMA'd once

    wbytes = jnp.dtype(cdt).itemsize
    cost = pl.CostEstimate(
        flops=2 * B * (F * H1 + H1 * H2 + H2 * A),
        transcendentals=B * (H1 + H2),
        bytes_accessed=(B * F * x.dtype.itemsize + B * A * 4
                        + (F * H1 + H1 * H2 + H2 * A) * wbytes
                        + (H1 + H2 + A) * 4),
    )

    return pl.pallas_call(
        _mlp_kernel,
        out_shape=jax.ShapeDtypeStruct((B, A), jnp.float32),
        grid_spec=pltpu.PrefetchScalarGridSpec(
            num_scalar_prefetch=0,
            grid=grid,
            in_specs=[
                pl.BlockSpec((block_b, F), lambda i: (i, 0)),  # x (only streamed input)
                pl.BlockSpec((F, H1), const2d),    # w1 (resident)
                pl.BlockSpec((1, H1), const2d),    # b1
                pl.BlockSpec((H1, H2), const2d),   # w2
                pl.BlockSpec((1, H2), const2d),    # b2
                pl.BlockSpec((H2, A), const2d),    # w3
                pl.BlockSpec((1, A), const2d),     # b3
            ],
            out_specs=pl.BlockSpec((block_b, A), lambda i: (i, 0)),
        ),
        compiler_params=pltpu.CompilerParams(
            dimension_semantics=("parallel",),
            vmem_limit_bytes=32 * 1024 * 1024,
        ),
        cost_estimate=cost,
    )(x, w1, b1, w2, b2, w3, b3)


def init_params(key, dim_feat, dim_hidden, dim_act, dtype=jnp.float32):
    """Deterministic synthetic init; weights stored (in, out) (transposed
    relative to torch nn.Linear so the kernel computes h @ W + b directly)."""
    dims = (dim_feat,) + tuple(dim_hidden) + (dim_act,)
    params = []
    for i in range(len(dims) - 1):
        key, kw, kb = jax.random.split(key, 3)
        fan_in, fan_out = dims[i], dims[i + 1]
        w = jax.random.normal(kw, (fan_in, fan_out), dtype) / jnp.sqrt(
            jnp.asarray(fan_in, dtype))
        b = 0.01 * jax.random.normal(kb, (1, fan_out), dtype)
        params.extend([w, b])
    return tuple(params)


def reference_forward(x, params):
    w1, b1, w2, b2, w3, b3 = params
    h = jnp.tanh(x @ w1 + b1)
    h = jnp.tanh(h @ w2 + b2)
    return h @ w3 + b3


if __name__ == "__main__":
    # Small shapes consistent with the module's forward:
    #   dim_feat=32, dim_hidden=(64, 64), dim_act=16, batch=64
    B, DIM_FEAT, DIM_HIDDEN, DIM_ACT = 64, 32, (64, 64), 16

    key = jax.random.PRNGKey(0)
    key, kx = jax.random.split(key)
    x = jax.random.normal(kx, (B, DIM_FEAT), jnp.float32)
    params = init_params(key, DIM_FEAT, DIM_HIDDEN, DIM_ACT)

    ref = reference_forward(x, params)
    net = jax.jit(categorical_pi_net)

    # 1) f32 compute path: correctness check.
    p_f32 = prepare_params(params, jnp.float32)
    logits_f32 = net(x, p_f32)
    jax.block_until_ready(logits_f32)
    assert logits_f32.shape == (B, DIM_ACT), logits_f32.shape
    assert jnp.allclose(logits_f32, ref, atol=1e-3, rtol=1e-3), (
        float(jnp.max(jnp.abs(logits_f32 - ref))))

    # 2) bf16 MXU path (the performance configuration): loose tolerance.
    p_bf16 = prepare_params(params, jnp.bfloat16)
    logits_bf16 = net(x, p_bf16)
    jax.block_until_ready(logits_bf16)
    assert logits_bf16.shape == (B, DIM_ACT), logits_bf16.shape
    assert jnp.allclose(logits_bf16, ref, atol=5e-2, rtol=5e-2), (
        float(jnp.max(jnp.abs(logits_bf16 - ref))))

    print("KERNEL_OK")
</pallas_src>

<mosaic_0001>
module attributes {stable_mosaic.version = 11 : i64} {
  func.func @_mlp_kernel(%arg0: i32, %arg1: memref<16x32xf32, #tpu.memory_space<vmem>>, %arg2: memref<32x64xf32, #tpu.memory_space<vmem>>, %arg3: memref<1x64xf32, #tpu.memory_space<vmem>>, %arg4: memref<64x64xf32, #tpu.memory_space<vmem>>, %arg5: memref<1x64xf32, #tpu.memory_space<vmem>>, %arg6: memref<64x16xf32, #tpu.memory_space<vmem>>, %arg7: memref<1x16xf32, #tpu.memory_space<vmem>>, %arg8: memref<16x16xf32, #tpu.memory_space<vmem>>) attributes {dimension_semantics = [#tpu.dimension_semantics<parallel>], iteration_bounds = array<i64: 4>, scalar_prefetch = 0 : i64, scratch_operands = 0 : i64, tpu.core_type = #tpu.core_type<tc>, window_params = [{transform_indices = @transform_0, window_bounds = array<i64: 16, 32>}, {pipeline_mode = #tpu.pipeline_mode<synchronous>, transform_indices = @transform_1, window_bounds = array<i64: 32, 64>}, {pipeline_mode = #tpu.pipeline_mode<synchronous>, transform_indices = @transform_2, window_bounds = array<i64: 1, 64>}, {pipeline_mode = #tpu.pipeline_mode<synchronous>, transform_indices = @transform_3, window_bounds = array<i64: 64, 64>}, {pipeline_mode = #tpu.pipeline_mode<synchronous>, transform_indices = @transform_4, window_bounds = array<i64: 1, 64>}, {pipeline_mode = #tpu.pipeline_mode<synchronous>, transform_indices = @transform_5, window_bounds = array<i64: 64, 16>}, {pipeline_mode = #tpu.pipeline_mode<synchronous>, transform_indices = @transform_6, window_bounds = array<i64: 1, 16>}, {transform_indices = @transform_7, window_bounds = array<i64: 16, 16>}]} {
    %c0 = arith.constant 0 : index
    %c0_0 = arith.constant 0 : index
    %0 = vector.load %arg1[%c0, %c0_0] : memref<16x32xf32, #tpu.memory_space<vmem>>, vector<16x32xf32>
    %c0_1 = arith.constant 0 : index
    %c0_2 = arith.constant 0 : index
    %1 = vector.load %arg2[%c0_1, %c0_2] : memref<32x64xf32, #tpu.memory_space<vmem>>, vector<32x64xf32>
    %cst = arith.constant dense<0.000000e+00> : vector<16x64xf32>
    %2 = tpu.matmul %0, %1, %cst {dimension_numbers = #tpu.dot_dimension_numbers<[1], [0], [0], [1], [0, 0, 1, 1], [], []>} : vector<16x32xf32>, vector<32x64xf32>, vector<16x64xf32> -> vector<16x64xf32>
    %c0_3 = arith.constant 0 : index
    %c0_4 = arith.constant 0 : index
    %3 = vector.load %arg3[%c0_3, %c0_4] : memref<1x64xf32, #tpu.memory_space<vmem>>, vector<1x64xf32>
    %4 = vector.broadcast %3 : vector<1x64xf32> to vector<16x64xf32>
    %5 = arith.addf %2, %4 : vector<16x64xf32>
    %6 = math.tanh %5 : vector<16x64xf32>
    %c0_5 = arith.constant 0 : index
    %c0_6 = arith.constant 0 : index
    %7 = vector.load %arg4[%c0_5, %c0_6] : memref<64x64xf32, #tpu.memory_space<vmem>>, vector<64x64xf32>
    %cst_7 = arith.constant dense<0.000000e+00> : vector<16x64xf32>
    %8 = tpu.matmul %6, %7, %cst_7 {dimension_numbers = #tpu.dot_dimension_numbers<[1], [0], [0], [1], [0, 0, 1, 1], [], []>} : vector<16x64xf32>, vector<64x64xf32>, vector<16x64xf32> -> vector<16x64xf32>
    %c0_8 = arith.constant 0 : index
    %c0_9 = arith.constant 0 : index
    %9 = vector.load %arg5[%c0_8, %c0_9] : memref<1x64xf32, #tpu.memory_space<vmem>>, vector<1x64xf32>
    %10 = vector.broadcast %9 : vector<1x64xf32> to vector<16x64xf32>
    %11 = arith.addf %8, %10 : vector<16x64xf32>
    %12 = math.tanh %11 : vector<16x64xf32>
    %c0_10 = arith.constant 0 : index
    %c0_11 = arith.constant 0 : index
    %13 = vector.load %arg6[%c0_10, %c0_11] : memref<64x16xf32, #tpu.memory_space<vmem>>, vector<64x16xf32>
    %cst_12 = arith.constant dense<0.000000e+00> : vector<16x16xf32>
    %14 = tpu.matmul %12, %13, %cst_12 {dimension_numbers = #tpu.dot_dimension_numbers<[1], [0], [0], [1], [0, 0, 1, 1], [], []>} : vector<16x64xf32>, vector<64x16xf32>, vector<16x16xf32> -> vector<16x16xf32>
    %c0_13 = arith.constant 0 : index
    %c0_14 = arith.constant 0 : index
    %15 = vector.load %arg7[%c0_13, %c0_14] : memref<1x16xf32, #tpu.memory_space<vmem>>, vector<1x16xf32>
    %16 = vector.broadcast %15 : vector<1x16xf32> to vector<16x16xf32>
    %17 = arith.addf %14, %16 : vector<16x16xf32>
    %c0_15 = arith.constant 0 : index
    %c0_16 = arith.constant 0 : index
    %18 = vector.load %arg8[%c0_15, %c0_16] : memref<16x16xf32, #tpu.memory_space<vmem>>, vector<16x16xf32>
    tpu.vector_store %arg8[%c0_15, %c0_16], %17 {strides = array<i32>} : memref<16x16xf32, #tpu.memory_space<vmem>>, vector<16x16xf32>,
    return
  }
  func.func @transform_0(%arg0: i32) -> (i32, i32) {
    %c0_i32 = arith.constant 0 : i32
    %c0_i32_0 = arith.constant 0 : i32
    return %arg0, %c0_i32 : i32, i32
  }
  func.func @transform_1(%arg0: i32) -> (i32, i32) {
    %c0_i32 = arith.constant 0 : i32
    %c0_i32_0 = arith.constant 0 : i32
    %c0_i32_1 = arith.constant 0 : i32
    return %c0_i32, %c0_i32_0 : i32, i32
  }
  func.func @transform_2(%arg0: i32) -> (i32, i32) {
    %c0_i32 = arith.constant 0 : i32
    %c0_i32_0 = arith.constant 0 : i32
    %c0_i32_1 = arith.constant 0 : i32
    return %c0_i32, %c0_i32_0 : i32, i32
  }
  func.func @transform_3(%arg0: i32) -> (i32, i32) {
    %c0_i32 = arith.constant 0 : i32
    %c0_i32_0 = arith.constant 0 : i32
    %c0_i32_1 = arith.constant 0 : i32
    return %c0_i32, %c0_i32_0 : i32, i32
  }
  func.func @transform_4(%arg0: i32) -> (i32, i32) {
    %c0_i32 = arith.constant 0 : i32
    %c0_i32_0 = arith.constant 0 : i32
    %c0_i32_1 = arith.constant 0 : i32
    return %c0_i32, %c0_i32_0 : i32, i32
  }
  func.func @transform_5(%arg0: i32) -> (i32, i32) {
    %c0_i32 = arith.constant 0 : i32
    %c0_i32_0 = arith.constant 0 : i32
    %c0_i32_1 = arith.constant 0 : i32
    return %c0_i32, %c0_i32_0 : i32, i32
  }
  func.func @transform_6(%arg0: i32) -> (i32, i32) {
    %c0_i32 = arith.constant 0 : i32
    %c0_i32_0 = arith.constant 0 : i32
    %c0_i32_1 = arith.constant 0 : i32
    return %c0_i32, %c0_i32_0 : i32, i32
  }
  func.func @transform_7(%arg0: i32) -> (i32, i32) {
    %c0_i32 = arith.constant 0 : i32
    %c0_i32_0 = arith.constant 0 : i32
    return %arg0, %c0_i32 : i32, i32
  }
}

</mosaic_0001>

<bundles_post_ra>
// kernel: categorical_pi_net.1
= control target key start
LH: loop header
LB: loop body
LE: loop exit
PB: predicated region body
PF: predicated region fallthrough
CT: control target
= control target key end

     0   :  { %s832_s24 = smov 0   ;;  %s929_s0 = inlined_call_operand.vmem [shape: f32[64,32], index: 0, kind: input, shape index: {}]   ;;  %s930_s1 = inlined_call_operand.vmem [shape: f32[32,64], index: 1, kind: input, shape index: {}]   ;;  %s931_s2 = inlined_call_operand.vmem [shape: f32[1,64], index: 2, kind: input, shape index: {}]   ;;  %s932_s3 = inlined_call_operand.vmem [shape: f32[64,64], index: 3, kind: input, shape index: {}]   ;;  %s933_s4 = inlined_call_operand.vmem [shape: f32[1,64], index: 4, kind: input, shape index: {}]   ;;  %s934_s5 = inlined_call_operand.vmem [shape: f32[64,16], index: 5, kind: input, shape index: {}]   ;;  %s935_s6 = inlined_call_operand.vmem [shape: f32[1,16], index: 6, kind: input, shape index: {}]   ;;  %s936_s7 = inlined_call_operand.vmem [shape: f32[64,16], index: 7, kind: output, shape index: {}]  }
   0x1 LB: > { %s633_s25 = sadd.s32 4294967295, %s790_s24   ;;  %p637_p0 = scmp.ge.s32.totalorder %s790_s24, 1  ;;  %s790_s24 = sphi %s832_s24, %s17_s24  }
   0x2   : > { %p238_p1 = scmp.lt.s32.totalorder %s790_s24, 5 }
   0x4   : > { %p239_p2 = pnand %p637_p0, %p238_p1 }
   0x5   : > { %v284_v0 = vld [vmem:[%s930_s1] sm:$0xff] (!%p239_p2)  ;;  %v285_v1 = vld [vmem:[%s930_s1 + $0x8] sm:$0xff] (!%p239_p2)  ;;  %v286_v2 = vld [vmem:[%s930_s1 + $0x10] sm:$0xff] (!%p239_p2)  ;;  %s638_s9 = sshll.u32 (!%p239_p2), %s633_s25, 1  ;;  %vm295_vm0 = vcmask (!%p239_p2), 261120   ;;  %vm394_vm1 = vcmask (!%p239_p2), 523264  }
   0x6   : > { %242 = sbr.rel (%p239_p2) target bundleno = 688 (0x2b0), region = 48  ;;  %v728_v3 = vpack.c.bf16 (!%p239_p2), %v285_v1, %v284_v0  ;;  %v287_v4 = vld [vmem:[%s930_s1 + $0x18] sm:$0xff] (!%p239_p2)  ;;  %p271_p3 = scmp.lt.s32.totalorder (!%p239_p2), %s638_s9, 7  ;;  %v379_v8 = vld [vmem:[%s932_s3] sm:$0xff] (!%p239_p2)  ;;  %v380_v9 = vld [vmem:[%s932_s3 + $0x8] sm:$0xff] (!%p239_p2)  ;;  %vm574_vm2 = vcmask (!%p239_p2), 130048  }
   0x7   : > { %v732_v5 = vpack.c.bf16 (!%p239_p2), %v287_v4, %v286_v2  ;;  %v736_v10 = vpack.c.bf16 (!%p239_p2), %v380_v9, %v379_v8  ;;  %v381_v11 = vld [vmem:[%s932_s3 + $0x10] sm:$0xff] (!%p239_p2)  ;;  %v382_v12 = vld [vmem:[%s932_s3 + $0x18] sm:$0xff] (!%p239_p2)  ;;  %v383_v14 = vld [vmem:[%s932_s3 + $0x20] sm:$0xff] (!%p239_p2) }
   0x8   : > { %729 = vmatprep.subr.bf16.mxu0 (!%p239_p2), %v728_v3  ;;  %v740_v13 = vpack.c.bf16 (!%p239_p2), %v382_v12, %v381_v11  ;;  %v384_v15 = vld [vmem:[%s932_s3 + $0x28] sm:$0xff] (!%p239_p2)  ;;  %v385_v16 = vld [vmem:[%s932_s3 + $0x30] sm:$0xff] (!%p239_p2)  ;;  %v386_v18 = vld [vmem:[%s932_s3 + $0x38] sm:$0xff] (!%p239_p2) }
   0x9   : > { %731 = vmatpush3.bf16.msra.mxu0 (!%p239_p2), %v728_v3  ;;  %737 = vmatprep.subr.bf16.mxu1 (!%p239_p2), %v736_v10  ;;  %v744_v17 = vpack.c.bf16 (!%p239_p2), %v384_v15, %v383_v14  ;;  %v748_v19 = vpack.c.bf16 (!%p239_p2), %v386_v18, %v385_v16  ;;  %v642_v20 = vld [vmem:[%s931_s2] ss:$0 sm:$0xff] (!%p239_p2)  ;;  %v479_v28 = vld [vmem:[%s934_s5 + $0x8] sm:$0xff] (!%p239_p2)  ;;  %v480_v30 = vld [vmem:[%s934_s5 + $0x10] sm:$0xff] (!%p239_p2) }
   0xa   : > { %733 = vmatprep.subr.bf16.mxu0 (!%p239_p2), %v732_v5  ;;  %739 = vmatpush3.bf16.msra.mxu1 (!%p239_p2), %v736_v10  ;;  %v478_v27 = vld [vmem:[%s934_s5] sm:$0xff] (!%p239_p2)  ;;  %v481_v31 = vld [vmem:[%s934_s5 + $0x18] sm:$0xff] (!%p239_p2)  ;;  %v483_v34 = vld [vmem:[%s934_s5 + $0x28] sm:$0xff] (!%p239_p2) }
   0xb   : > { %741 = vmatprep.subr.bf16.mxu1 (!%p239_p2), %v740_v13  ;;  %v752_v29 = vpack.c.bf16 (!%p239_p2), %v479_v28, %v478_v27  ;;  %v756_v32 = vpack.c.bf16 (!%p239_p2), %v481_v31, %v480_v30  ;;  %v482_v33 = vld [vmem:[%s934_s5 + $0x20] sm:$0xff] (!%p239_p2)  ;;  %v484_v35 = vld [vmem:[%s934_s5 + $0x30] sm:$0xff] (!%p239_p2)  ;;  %v485_v37 = vld [vmem:[%s934_s5 + $0x38] sm:$0xff] (!%p239_p2) }
   0xc   : > { %v760_v36 = vpack.c.bf16 (!%p239_p2), %v483_v34, %v482_v33  ;;  %v764_v38 = vpack.c.bf16 (!%p239_p2), %v485_v37, %v484_v35  ;;  %v645_v39 = vld [vmem:[%s933_s4] ss:$0 sm:$0xff] (!%p239_p2) }
   0xd   : > { %s938_s9 = smov (!%p271_p3, %s638_s9), 7  ;;  %735 = vmatpush3.bf16.msra.mxu0 %v732_v5  ;;  %v648_v46 = vld [vmem:[%s935_s6] ss:$0 sm:$0xff] }
   0xe   : > { %s639_s12 = sshll.u32 %s938_s9, 3  ;;  %743 = vmatpush3.bf16.msra.mxu1 %v740_v13  ;;  %753 = vmatprep.subr.bf16.mxu0 %v752_v29 }
   0xf   : > { %s274_s15 = scalar_lea.vmem %s929_s0, %s639_s12  ;;  %745 = vmatprep.subr.bf16.mxu1 %v744_v17  ;;  %s280_s16 = scalar_lea.vmem %s936_s7, %s639_s12 }
  0x10   : > { %v282_v6 = vld [vmem:[%s274_s15] sm:$0xff]  ;;  %v283_v7 = vld [vmem:[%s274_s15 + $0x8] sm:$0xff] }
  0x11   : > { %687 = vmatprep.mubr.msk.f32.mxu0 %vm295_vm0, %v282_v6 }
  0x12   : > { %688 = vmatmul.mubr.msk.f32.vlgmr.msra.gmra.mrb[0].mxu0 %vm295_vm0, %v283_v7  ;;  %747 = vmatpush3.bf16.msra.mxu1 %v744_v17 }
  0x13   : > { %749 = vmatprep.subr.bf16.mxu1 %v748_v19  ;;  %755 = vmatpush3.bf16.msra.mxu0 %v752_v29 }
  0x14   : > { %757 = vmatprep.subr.bf16.mxu0 %v756_v32 }
  0x16   : > { %751 = vmatpush3.bf16.msra.mxu1 %v748_v19 }
  0x17   : > { %759 = vmatpush3.bf16.msra.mxu0 %v756_v32 }
  0x18   : > { %761 = vmatprep.subr.bf16.mxu0 %v760_v36 }
  0x1b   : > { %763 = vmatpush3.bf16.msra.mxu0 %v760_v36 }
  0x1c   : > { %765 = vmatprep.subr.bf16.mxu0 %v764_v38 }
  0x1f   : > { %767 = vmatpush3.bf16.msra.mxu0 %v764_v38 }
  0xe5   : > { %v689_v21 = vpop.f32.mrb[0].mxu0 }
  0xe6   : > { %v374_v22 = vadd.f32 %v689_v21, %v642_v20  ;;  %v368_v23 = vpop.f32.mrb[1].mxu0 }
  0xe7   : > { %v369_v24 = vadd.f32 %v642_v20, %v368_v23 }
  0xe9   : > { %776 = vtanh.f32 %v369_v24 }
  0xea   : > { %778 = vtanh.f32 %v374_v22 }
  0xf3   : > { %v777_v25 = vpop.eup %776 }
  0xf4   : > { %v779_v26 = vpop.eup %778  ;;  %706 = vmatprep.mubr.msk.f32.mxu1 %vm394_vm1, %v777_v25 }
  0xf5   : > { %707 = vmatmul.mubr.msk.f32.vlgmr.msra.gmra.mrb[0].mxu1 %vm394_vm1, %v779_v26 }
 0x1c8   : > { %v708_v40 = vpop.f32.mrb[0].mxu1 }
 0x1c9   : > { %v473_v41 = vadd.f32 %v708_v40, %v645_v39  ;;  %v467_v42 = vpop.f32.mrb[1].mxu1 }
 0x1ca   : > { %v468_v43 = vadd.f32 %v645_v39, %v467_v42 }
 0x1cc   : > { %780 = vtanh.f32 %v468_v43 }
 0x1cd   : > { %782 = vtanh.f32 %v473_v41 }
 0x1d6   : > { %v781_v44 = vpop.eup %780 }
 0x1d7   : > { %v783_v45 = vpop.eup %782  ;;  %725 = vmatprep.mubr.msk.f32.mxu0 %vm394_vm1, %v781_v44 }
 0x1d8   : > { %726 = vmatmul.mubr.msk.f32.vlgmr.msra.gmra.mrb[2].mxu0 %vm394_vm1, %v783_v45 }
 0x2ab   : > { %v727_v47 = vpop.f32.mrb[2].mxu0 }
 0x2ac   : > { %v565_v48 = vpop.f32.mrb[3].mxu0  ;;  %v571_v50 = vadd.f32 %v727_v47, %v648_v46 }
 0x2ad   : > { %v566_v49 = vadd.f32 %v648_v46, %v565_v48 }
 0x2ae   : > { %576 = vst.msk [vmem:[%s280_s16 + $0x8] sm:$0xff] %vm574_vm2, %v571_v50 }
 0x2af   : > { %575 = vst.msk [vmem:[%s280_s16] sm:$0xff] %vm574_vm2, %v566_v49 }
 0x2b0 PF: > { %s17_s24 = sadd.s32 1, %s790_s24  }
 0x2b1   : > { %p14_p4 = scmp.ge.s32.totalorder %s17_s24, 6  }
 0x2b3   :  { %16 = sbr.rel (!%p14_p4) target bundleno = 1 (0x1), region = 78 }

</bundles_post_ra>
